<compile_context>
chip_gen: v5e
topology: v5e:2x2
jax: 0.10.0
libtpu: 0.0.40
codegen_flags: <defaults>
</compile_context>

<pallas_src>
import jax
import jax.numpy as jnp
from jax.experimental import pallas as pl
from jax.experimental.pallas import tpu as pltpu


def _round_up(x: int, m: int) -> int:
    return ((x + m - 1) // m) * m


def _patch_encoder_kernel(x_ref, w_ref, pe_ref, o_ref):
    # x_ref : (TM, D)   bf16 patch tile (one batch element)
    # w_ref : (D, TN)   bf16 projection-weight tile (W.T slice)
    # pe_ref: (TM, TN)  f32  (pos_emb + bias) tile
    # o_ref : (TM, TN)  f32  output tile
    y = jnp.dot(x_ref[...], w_ref[...], preferred_element_type=jnp.float32)  # MXU
    o_ref[...] = (y + pe_ref[...]).astype(o_ref.dtype)                       # VPU


def patch_encoder_linear(patches, weight, bias, pos_emb):
    """
    patches: (B, P, D) float32
    weight : (E, D)    float32   (torch Linear: out_features x in_features)
    bias   : (E,)      float32
    pos_emb: (P, E)    float32
    returns: (B, P, E) float32
    """
    B, P, D = patches.shape
    E = weight.shape[0]

    # ---- tile selection ---------------------------------------------------
    # M tile: MXU-friendly, but never bigger than (padded) P.
    if P >= 512:
        tm = 256
    elif P >= 128:
        tm = 128
    else:
        tm = _round_up(P, 8)            # tiny P: one full-extent tile
    p_pad = _round_up(P, tm)

    # N tile: lane-dense (multiple of 128). Small E -> single full tile.
    e_pad = _round_up(E, 128)
    if e_pad <= 512:
        tn = e_pad
    elif e_pad % 256 == 0:
        tn = 256
    else:
        tn = 128

    # ---- wrapper-side prep: fold bias into pos_emb, transpose W, cast, pad ----
    w_t = weight.T.astype(jnp.bfloat16)                       # (D, E)
    pe_b = (pos_emb + bias[None, :]).astype(jnp.float32)      # (P, E)
    x = patches.astype(jnp.bfloat16)                          # (B, P, D)

    if p_pad != P:
        x = jnp.pad(x, ((0, 0), (0, p_pad - P), (0, 0)))
        pe_b = jnp.pad(pe_b, ((0, p_pad - P), (0, 0)))
    if e_pad != E:
        w_t = jnp.pad(w_t, ((0, 0), (0, e_pad - E)))
        pe_b = jnp.pad(pe_b, ((0, 0), (0, e_pad - E)))

    grid = (B, p_pad // tm, e_pad // tn)

    out_padded = pl.pallas_call(
        _patch_encoder_kernel,
        out_shape=jax.ShapeDtypeStruct((B, p_pad, e_pad), jnp.float32),
        grid_spec=pltpu.PrefetchScalarGridSpec(
            num_scalar_prefetch=0,
            grid=grid,
            in_specs=[
                # per-(batch, M-tile) patch block; stays resident across the
                # innermost j (E-tile) sweep. Batch dim squeezed away.
                pl.BlockSpec((pl.Squeezed(), tm, D), lambda b, i, j: (b, i, 0)),
                # weight N-tile (shared across batch / M-tiles)
                pl.BlockSpec((D, tn), lambda b, i, j: (0, j)),
                # (pos_emb + bias) tile, shared across batch
                pl.BlockSpec((tm, tn), lambda b, i, j: (i, j)),
            ],
            out_specs=pl.BlockSpec(
                (pl.Squeezed(), tm, tn), lambda b, i, j: (b, i, j)
            ),
        ),
        compiler_params=pltpu.CompilerParams(
            # no reduction axis (K unsplit) -> every axis shardable across TCs
            dimension_semantics=("parallel", "parallel", "parallel"),
            vmem_limit_bytes=32 * 1024 * 1024,
        ),
    )(x, w_t, pe_b)

    return out_padded[:, :P, :E]


if __name__ == "__main__":
    # Small deterministic shapes consistent with the module.
    batch = 2
    num_patches = 8
    token_dim = 32
    emb_dim = 32

    key = jax.random.PRNGKey(0)
    k_x, k_w, k_b, k_pe = jax.random.split(key, 4)

    patches = jax.random.normal(k_x, (batch, num_patches, token_dim), jnp.float32)
    # nn.Linear shapes: weight (emb_dim, token_dim), bias (emb_dim,)
    weight = jax.random.normal(k_w, (emb_dim, token_dim), jnp.float32) * 0.05
    bias = jax.random.normal(k_b, (emb_dim,), jnp.float32) * 0.05
    # nn.Parameter(torch.randn(num_patches, emb_dim))
    pos_emb = jax.random.normal(k_pe, (num_patches, emb_dim), jnp.float32)

    out = patch_encoder_linear(patches, weight, bias, pos_emb)
    out = jax.block_until_ready(out)
    assert out.shape == (batch, num_patches, emb_dim)

    # Reference with matching bf16 input rounding (f32 accumulation): tight check.
    ref_bf16 = (
        jnp.einsum(
            "bpd,de->bpe",
            patches.astype(jnp.bfloat16).astype(jnp.float32),
            weight.T.astype(jnp.bfloat16).astype(jnp.float32),
        )
        + bias
        + pos_emb
    )
    assert jnp.allclose(out, ref_bf16, atol=1e-3, rtol=1e-3)

    # Pure-f32 torch-semantics reference: loose check (bf16 input quantization).
    ref_f32 = jnp.einsum("bpd,ed->bpe", patches, weight) + bias + pos_emb
    assert jnp.allclose(out, ref_f32, atol=5e-2, rtol=5e-2)

    print("KERNEL_OK")
</pallas_src>

<mosaic_0001>
module attributes {stable_mosaic.version = 11 : i64} {
  func.func @_patch_encoder_kernel(%arg0: i32, %arg1: i32, %arg2: i32, %arg3: memref<1x8x32xbf16, #tpu.memory_space<vmem>>, %arg4: memref<32x128xbf16, #tpu.memory_space<vmem>>, %arg5: memref<8x128xf32, #tpu.memory_space<vmem>>, %arg6: memref<1x8x128xf32, #tpu.memory_space<vmem>>) attributes {dimension_semantics = [#tpu.dimension_semantics<parallel>, #tpu.dimension_semantics<parallel>, #tpu.dimension_semantics<parallel>], iteration_bounds = array<i64: 2, 1, 1>, scalar_prefetch = 0 : i64, scratch_operands = 0 : i64, tpu.core_type = #tpu.core_type<tc>, window_params = [{transform_indices = @transform_0, window_bounds = array<i64: 1, 8, 32>}, {transform_indices = @transform_1, window_bounds = array<i64: 32, 128>}, {transform_indices = @transform_2, window_bounds = array<i64: 8, 128>}, {transform_indices = @transform_3, window_bounds = array<i64: 1, 8, 128>}]} {
    %c0 = arith.constant 0 : index
    %c0_0 = arith.constant 0 : index
    %c0_1 = arith.constant 0 : index
    %0 = vector.load %arg3[%c0, %c0_0, %c0_1] : memref<1x8x32xbf16, #tpu.memory_space<vmem>>, vector<1x8x32xbf16>
    %1 = vector.shape_cast %0 : vector<1x8x32xbf16> to vector<8x32xbf16>
    %c0_2 = arith.constant 0 : index
    %c0_3 = arith.constant 0 : index
    %2 = vector.load %arg4[%c0_2, %c0_3] : memref<32x128xbf16, #tpu.memory_space<vmem>>, vector<32x128xbf16>
    %cst = arith.constant dense<0.000000e+00> : vector<8x128xf32>
    %3 = tpu.matmul %1, %2, %cst {dimension_numbers = #tpu.dot_dimension_numbers<[1], [0], [0], [1], [0, 0, 1, 1], [], []>} : vector<8x32xbf16>, vector<32x128xbf16>, vector<8x128xf32> -> vector<8x128xf32>
    %c0_4 = arith.constant 0 : index
    %c0_5 = arith.constant 0 : index
    %4 = vector.load %arg5[%c0_4, %c0_5] : memref<8x128xf32, #tpu.memory_space<vmem>>, vector<8x128xf32>
    %5 = arith.addf %3, %4 : vector<8x128xf32>
    %c0_6 = arith.constant 0 : index
    %c0_7 = arith.constant 0 : index
    %c0_8 = arith.constant 0 : index
    %6 = vector.load %arg6[%c0_6, %c0_7, %c0_8] : memref<1x8x128xf32, #tpu.memory_space<vmem>>, vector<1x8x128xf32>
    %7 = vector.shape_cast %6 : vector<1x8x128xf32> to vector<8x128xf32>
    %8 = vector.shape_cast %5 : vector<8x128xf32> to vector<1x8x128xf32>
    tpu.vector_store %arg6[%c0_6, %c0_7, %c0_8], %8 {strides = array<i32>} : memref<1x8x128xf32, #tpu.memory_space<vmem>>, vector<1x8x128xf32>,
    return
  }
  func.func @transform_0(%arg0: i32, %arg1: i32, %arg2: i32) -> (i32, i32, i32) {
    %c0_i32 = arith.constant 0 : i32
    %c0_i32_0 = arith.constant 0 : i32
    return %arg0, %arg1, %c0_i32 : i32, i32, i32
  }
  func.func @transform_1(%arg0: i32, %arg1: i32, %arg2: i32) -> (i32, i32) {
    %c0_i32 = arith.constant 0 : i32
    %c0_i32_0 = arith.constant 0 : i32
    return %c0_i32, %arg2 : i32, i32
  }
  func.func @transform_2(%arg0: i32, %arg1: i32, %arg2: i32) -> (i32, i32) {
    %c0_i32 = arith.constant 0 : i32
    return %arg1, %arg2 : i32, i32
  }
  func.func @transform_3(%arg0: i32, %arg1: i32, %arg2: i32) -> (i32, i32, i32) {
    %c0_i32 = arith.constant 0 : i32
    return %arg0, %arg1, %arg2 : i32, i32, i32
  }
}

</mosaic_0001>

<bundles_post_ra>
// kernel: tpu_custom_call.1
= control target key start
LH: loop header
LB: loop body
LE: loop exit
PB: predicated region body
PF: predicated region fallthrough
CT: control target
= control target key end

     0   :  { %8 = vsyncpa [#allocation3], 0  ;;  %s885_s0 = inlined_call_operand.hbm [shape: bf16[2,8,32], index: 0, kind: input, shape index: {}]   ;;  %s886_s1 = inlined_call_operand.hbm [shape: bf16[32,128], index: 1, kind: input, shape index: {}]   ;;  %s887_s2 = inlined_call_operand.hbm [shape: f32[8,128], index: 2, kind: input, shape index: {}]   ;;  %s888_s3 = inlined_call_operand.hbm [shape: f32[2,8,128], index: 3, kind: output, shape index: {}]  }
   0x1   :  { %10 = vsyncpa [#allocation3 + $0x1], 0 }
   0x2   :  { %11 = vsyncpa [#allocation6], 0 }
   0x3   :  { %12 = vsyncpa [#allocation4], 0 }
   0x4   :  { %14 = vsyncpa [#allocation4 + $0x1], 0  ;;  %s740_s12 = smov 0   ;;  %s742_s13 = smov 0  }
   0x5   :  { %s744_s14 = smov 0   ;;  %s746_s15 = smov 0  }
   0x6   :  { %s748_s16 = smov 0   ;;  %s750_s17 = smov 0  }
   0x7 LB: > { %s425_s18 = sadd.s32 4294967295, %s714_s17   ;;  %p427_p0 = scmp.ge.s32.totalorder %s714_s17, 1  ;;  %s714_s17 = sphi %s750_s17, %s20_s17   ;;  %s710_s16 = sphi %s748_s16, %s898_s16   ;;  %s706_s15 = sphi %s746_s15, %s897_s15   ;;  %s702_s14 = sphi %s744_s14, %s896_s14   ;;  %s698_s13 = sphi %s742_s13, %s895_s13   ;;  %s694_s12 = sphi %s740_s12, %s894_s12  }
   0x8   : > { %p774_p1 = scmp.eq.s32.totalorder %s425_s18, 0  ;;  %p156_p2 = scmp.lt.s32.totalorder %s714_s17, 3 }
   0x9   : > { %s169_s22 = sshll.u32 %s886_s1, 4  ;;  %s716_s24 = smov [#allocation5]   ;;  %s170_s22 = int_to_ptr.hbm [resolvable:$true] %s169_s22 }
   0xa   : > { %p782_p3 = pnand %p427_p0, %p156_p2  ;;  %s171_s25 = sshll.u32 %s716_s24, 4  ;;  %s172_s25 = int_to_ptr.vmem [resolvable:$true] %s171_s25 }
   0xb   : > { %p430_p6 = scmp.ge.s32.totalorder %s714_s17, 2  ;;  %s187_s28 = sshll.u32 %s887_s2, 4  ;;  %s188_s28 = int_to_ptr.hbm [resolvable:$true] %s187_s28 }
   0xc   : > { %p465_p4 = pneg %p782_p3  ;;  %s717_s29 = smov 64  }
   0xd   : > { %s718_s30 = smov 4   ;;  %s719_s4 = smov [#allocation7]  }
   0xe   : > { %p466_p5 = pnand %p465_p4, %p774_p1  ;;  %s189_s5 = sshll.u32 %s719_s4, 4  ;;  %s190_s5 = int_to_ptr.vmem [resolvable:$true] %s189_s5 }
   0xf   : > { %s39_s6 = sadd.s32 1, %s710_s16  ;;  %s426_s7 = sadd.s32 4294967294, %s714_s17  }
  0x10   : > { %468 = dma.hbm_to_vmem [thread:$0]  (!%p466_p5), %s170_s22, 256, %s172_s25, [#allocation6], %s717_s29, %s717_s29, %s718_s30  }
  0x11   : > { %471 = dma.hbm_to_vmem [thread:$0]  (!%p466_p5), %s188_s28, 128, %s190_s5, [#allocation6]  }
  0x12   : > { %p41_p7 = scmp.ge.s32.totalorder %s39_s6, 2  ;;  %s48_s8 = sadd.s32 1, %s702_s14 }
  0x13   : > { %p55_p8 = scmp.ne.s32.totalorder %s702_s14, %s698_s13  ;;  %p56_p9 = scmp.eq.s32.totalorder %s714_s17, 0 }
  0x14   : > { %s900_s6 = smov (%p41_p7, %s39_s6), 0  ;;  %p61_p10 = scmp.ne.s32.totalorder %s698_s13, %s694_s12 }
  0x15   : > { %s43_s9 = ssub.s32 %s710_s16, %s900_s6  ;;  %p143_p11 = scmp.eq.s32.totalorder %s425_s18, 1 }
  0x16   : > { %p46_p12 = scmp.eq.s32.totalorder %s43_s9, 0  ;;  %p810_p13 = por %p774_p1, %p61_p10 }
  0x17   : > { %p814_p0 = por %p143_p11, %p55_p8  ;;  %p149_p2 = scmp.eq.s32.totalorder %s426_s7, 1 }
  0x18   : > { %s819_s20 = scalar_select %p46_p12, %s702_s14, %s48_s8  }
  0x19   : > { %p57_p4 = por %p56_p9, %p55_p8  ;;  %p821_p5 = por %p149_p2, %p61_p10 }
  0x1a   : > { %s200_s22 = sand.u32 1, %s702_s14   ;;  %s432_s18 = sshll.u32 %s710_s16, 2 }
  0x1b   : > { %p482_p7 = scmp.lt.s32.totalorder %s714_s17, 2  ;;  %s431_s24 = sshll.u32 %s200_s22, 2 }
  0x1c   : > { %s209_s27 = scalar_lea.hbm %s885_s0, %s432_s18  ;;  %s204_s29 = scalar_lea.vmem [#allocation2], %s431_s24 }
  0x1d   : > { %s211_s28 = sshll.u32 %s209_s27, 4  ;;  %s213_s30 = sshll.u32 %s204_s29, 4  ;;  %s212_s28 = int_to_ptr.hbm [resolvable:$true] %s211_s28  ;;  %s214_s30 = int_to_ptr.vmem [resolvable:$true] %s213_s30 }
  0x1e   : > { %p473_p11 = pnand %p482_p7, %p57_p4  ;;  %s201_s4 = scalar_lea.sflag [#allocation3], %s200_s22 }
  0x1f   : > { %222 = sbr.rel (%p782_p3) target bundleno = 181 (0xb5), region = 32  ;;  %s834_s5 = sand.u32 (!%p782_p3), 1, %s698_s13  }
  0x20   : > { %475 = dma.hbm_to_vmem [thread:$0]  (!%p473_p11), %s212_s28, 64, %s214_s30, %s201_s4  }
  0x21   : > { %s434_s7 = sshll.u32 (!%p782_p3), %s834_s5, 2  ;;  %s225_s8 = scalar_lea.sflag (!%p782_p3), [#allocation3], %s834_s5 }
  0x22   : > { %s228_s9 = scalar_lea.vmem (!%p782_p3), [#allocation2], %s434_s7 }
  0x24   : > { %681 = dma.done.wait (%p810_p13), %s225_s8, 64  }
  0x25   : > { %683 = vsyncadd (%p810_p13), %s225_s8, 4294967232 }
  0x26   : > { %685 = dma.done.wait (%p774_p1), [#allocation6], 384  }
  0x27   : > { %687 = vsyncadd (%p774_p1), [#allocation6], 4294966912  ;;  %v452_v0 = vld [vmem:[#allocation5 + $0x8] sm:$0xff]  ;;  %v451_v1 = vld [vmem:[#allocation5] sm:$0xff]  ;;  %vm281_vm0 = vcmask 261120   ;;  %s448_s23 = sshll.u32 %s706_s15, 3 }
  0x28   : > { %291 = vmatpush.bf16.msra.mxu0 %v452_v0  ;;  %v263_v2 = vld [vmem:[%s228_s9] sm:$0xf]  ;;  %s437_s22 = sshll.u32 %s834_s5, 3  ;;  %s312_s24 = scalar_lea.hbm %s888_s3, %s448_s23  ;;  %v268_v3 = vld [vmem:[#allocation7] sm:$0xff] }
  0x29   : > { %s261_s19 = scalar_lea.vmem [#allocation8], %s437_s22  ;;  %s316_s26 = sshll.u32 %s312_s24, 4  ;;  %s317_s26 = int_to_ptr.hbm [resolvable:$true] %s316_s26 }
  0x2a   : > { %s314_s25 = sshll.u32 %s261_s19, 4  ;;  %s300_s27 = scalar_lea.sflag [#allocation4], %s834_s5  ;;  %s315_s25 = int_to_ptr.vmem [resolvable:$true] %s314_s25 }
  0x2b   : > { %s642_s28 = sshra.s32 %s317_s26, 4  ;;  %s648_s4 = scalar_lea.hbm %s888_s3, 16  ;;  %s643_s28 = int_to_ptr.hbm [resolvable:$true] %s642_s28 }
  0x2c   : > { %292 = vmatpush.bf16.msra.mxu0 %v451_v1  ;;  %s644_s29 = scalar_lea.hbm %s643_s28, 8  ;;  %p649_p9 = scmp.lt.s32.totalorder %s643_s28, %s888_s3 }
  0x2d   : > { %p645_p1 = scmp.ne.s32.totalorder %s643_s28, %s644_s29  ;;  %p650_p10 = scmp.lt.s32.totalorder %s648_s4, %s644_s29 }
  0x2f   : > { %446 = vmatmul.msk.bf16.vlgmr.msra.gmra.mxu0 %vm281_vm0, %v263_v2  ;;  %p646_p3 = pnand %p645_p1, %p814_p0  ;;  %p651_p12 = por %p650_p10, %p649_p9 }
  0x31   : > { %p647_p8 = pneg %p646_p3 }
  0x33   : > { %p652_p13 = pnand %p651_p12, %p647_p8 }
  0xac   : > { %v294_v4 = vpop.f32.mrf.mxu0 }
  0xad   : > { %v295_v5 = vadd.f32 %v294_v4, %v268_v3 }
  0xaf   : > { %298 = vst [vmem:[%s261_s19] sm:$0xff] %v295_v5 }
  0xb0   : > { %655 = shalt.err (!%p652_p13)
}
  0xb1   : > { %463 = dma.vmem_to_hbm [thread:$0]  (%p814_p0), %s315_s25, 128, %s317_s26, %s300_s27  }
  0xb4   : > { %v296_v6 = vpop.f32.mrf.mxu0 }
  0xb5 PF: > { %s328_s5 = sand.u32 1, %s694_s12   ;;  %p477_p2 = pnand %p430_p6, %p821_p5 }
  0xb6   : > { %s329_s9 = scalar_lea.sflag [#allocation4], %s328_s5 }
  0xb7   : > { %p478_p4 = pneg %p477_p2 }
  0xb9   : > { %689 = dma.done.wait (%p478_p4), %s329_s9, 128  }
  0xba   : > { %691 = vsyncadd (%p478_p4), %s329_s9, 4294967168  ;;  %s20_s17 = sadd.s32 1, %s714_s17   ;;  %s894_s12 = smov %s698_s13 }
  0xbb   : > { %p17_p7 = scmp.ge.s32.totalorder %s20_s17, 4   ;;  %s895_s13 = smov %s702_s14 }
  0xbc   : > { %s896_s14 = smov %s819_s20  ;;  %s897_s15 = smov %s710_s16 }
  0xbd   : > { %s898_s16 = smov %s900_s6  ;;  %19 = sbr.rel (!%p17_p7) target bundleno = 7 (0x7), region = 87 }
  0xc2   :  { %335 = vsyncpa [#allocation3], 1 }
  0xc3   :  { %337 = vsyncpa [#allocation3 + $0x1], 1 }
  0xc4   :  { %338 = vsyncpa [#allocation6], 1 }
  0xc5   :  { %339 = vsyncpa [#allocation4], 1 }
  0xc6   :  { %341 = vsyncpa [#allocation4 + $0x1], 1 }

</bundles_post_ra>
